<compile_context>
chip_gen: v5e
topology: v5e:2x2
jax: 0.10.0
libtpu: 0.0.40
codegen_flags: <defaults>
</compile_context>

<pallas_src>
import jax
import jax.numpy as jnp
from jax.experimental import pallas as pl
from jax.experimental.pallas import tpu as pltpu

EPS = 1e-5          # PyTorch BatchNorm2d default eps
LANES = 128
VMEM_LIMIT = 32 * 1024 * 1024


# ---------------------------------------------------------------------------
# Kernels
# ---------------------------------------------------------------------------

def _conv_stats_kernel(x_ref, w_ref, h_ref, s_ref, sq_ref):
    """h = x @ w (bf16 MXU, f32 acc); accumulate per-channel sum / sumsq."""
    @pl.when(pl.program_id(0) == 0)
    def _init():
        s_ref[...] = jnp.zeros_like(s_ref)
        sq_ref[...] = jnp.zeros_like(sq_ref)

    h = jnp.dot(x_ref[...].astype(jnp.bfloat16), w_ref[...],
                preferred_element_type=jnp.float32)
    h_ref[...] = h
    s_ref[...] += jnp.sum(h, axis=0, keepdims=True)
    sq_ref[...] += jnp.sum(h * h, axis=0, keepdims=True)


def _bn_relu_conv_stats_kernel(h_ref, scale_ref, shift_ref, w_ref,
                               o_ref, s_ref, sq_ref):
    """a = relu(h*scale + shift); o = a @ w; accumulate stats of o."""
    @pl.when(pl.program_id(0) == 0)
    def _init():
        s_ref[...] = jnp.zeros_like(s_ref)
        sq_ref[...] = jnp.zeros_like(sq_ref)

    a = jnp.maximum(h_ref[...] * scale_ref[...] + shift_ref[...], 0.0)
    o = jnp.dot(a.astype(jnp.bfloat16), w_ref[...],
                preferred_element_type=jnp.float32)
    o_ref[...] = o
    s_ref[...] += jnp.sum(o, axis=0, keepdims=True)
    sq_ref[...] += jnp.sum(o * o, axis=0, keepdims=True)


def _bn_add_relu_kernel(h_ref, scale_ref, shift_ref, res_ref, o_ref):
    """out = relu(h*scale + shift + residual)."""
    o_ref[...] = jnp.maximum(
        h_ref[...] * scale_ref[...] + shift_ref[...] + res_ref[...], 0.0)


# ---------------------------------------------------------------------------
# pallas_call wrappers
# ---------------------------------------------------------------------------

def _matmul_with_stats(x2d, w_bf16, tm):
    m, cin = x2d.shape
    cout = w_bf16.shape[1]
    return pl.pallas_call(
        _conv_stats_kernel,
        grid=(m // tm,),
        in_specs=[pl.BlockSpec((tm, cin), lambda i: (i, 0)),
                  pl.BlockSpec((cin, cout), lambda i: (0, 0))],
        out_specs=[pl.BlockSpec((tm, cout), lambda i: (i, 0)),
                   pl.BlockSpec((1, cout), lambda i: (0, 0)),
                   pl.BlockSpec((1, cout), lambda i: (0, 0))],
        out_shape=[jax.ShapeDtypeStruct((m, cout), jnp.float32),
                   jax.ShapeDtypeStruct((1, cout), jnp.float32),
                   jax.ShapeDtypeStruct((1, cout), jnp.float32)],
        compiler_params=pltpu.CompilerParams(
            dimension_semantics=("arbitrary",),   # M carries the BN-stat sum
            vmem_limit_bytes=VMEM_LIMIT),
    )(x2d, w_bf16)


def _bn_relu_matmul_with_stats(h, scale, shift, w_bf16, tm):
    m, cin = h.shape
    cout = w_bf16.shape[1]
    return pl.pallas_call(
        _bn_relu_conv_stats_kernel,
        grid=(m // tm,),
        in_specs=[pl.BlockSpec((tm, cin), lambda i: (i, 0)),
                  pl.BlockSpec((1, cin), lambda i: (0, 0)),
                  pl.BlockSpec((1, cin), lambda i: (0, 0)),
                  pl.BlockSpec((cin, cout), lambda i: (0, 0))],
        out_specs=[pl.BlockSpec((tm, cout), lambda i: (i, 0)),
                   pl.BlockSpec((1, cout), lambda i: (0, 0)),
                   pl.BlockSpec((1, cout), lambda i: (0, 0))],
        out_shape=[jax.ShapeDtypeStruct((m, cout), jnp.float32),
                   jax.ShapeDtypeStruct((1, cout), jnp.float32),
                   jax.ShapeDtypeStruct((1, cout), jnp.float32)],
        compiler_params=pltpu.CompilerParams(
            dimension_semantics=("arbitrary",),
            vmem_limit_bytes=VMEM_LIMIT),
    )(h, scale, shift, w_bf16)


def _bn_add_relu(h, scale, shift, residual, tm):
    m, c = h.shape
    return pl.pallas_call(
        _bn_add_relu_kernel,
        grid=(m // tm,),
        in_specs=[pl.BlockSpec((tm, c), lambda i: (i, 0)),
                  pl.BlockSpec((1, c), lambda i: (0, 0)),
                  pl.BlockSpec((1, c), lambda i: (0, 0)),
                  pl.BlockSpec((tm, c), lambda i: (i, 0))],
        out_specs=pl.BlockSpec((tm, c), lambda i: (i, 0)),
        out_shape=jax.ShapeDtypeStruct((m, c), jnp.float32),
        compiler_params=pltpu.CompilerParams(
            dimension_semantics=("parallel",),    # no reduction -> megacore ok
            vmem_limit_bytes=VMEM_LIMIT),
    )(h, scale, shift, residual)


# ---------------------------------------------------------------------------
# Host-side helpers
# ---------------------------------------------------------------------------

def _pad_to(a, shape):
    pads = [(0, t - s) for s, t in zip(a.shape, shape)]
    return jnp.pad(a, pads) if any(p for _, p in pads) else a


def _pick_tile(m, max_tm):
    tm = max_tm
    while tm >= 8:
        if m % tm == 0:
            return tm
        tm //= 2
    return m   # fall back to one full-extent block


def _finalize_bn(s, sq, m, gamma, beta):
    """One-pass stats -> folded BN affine: h*scale + shift."""
    mean = s / m
    var = jnp.maximum(sq / m - mean * mean, 0.0)   # biased var (training BN)
    scale = gamma * jax.lax.rsqrt(var + EPS)
    shift = beta - mean * scale
    return scale, shift


def bottleneck_forward(x_nchw, w1, w2, w3, g1, b1, g2, b2, g3, b3, *, tm=256):
    """Bottleneck_ forward, default config (all 1x1 convs, stride 1).

    x_nchw: (N, Cin, H, W) f32.  w1:(P,Cin)  w2:(P,P)  w3:(4P,P)  (1x1 convs,
    trailing 1x1 dims squeezed).  gamma/beta per BatchNorm.  Cin must equal 4P.
    """
    n, cin, h_, w_ = x_nchw.shape
    p = w1.shape[0]
    cout = w3.shape[0]
    assert cout == cin, "residual add requires inplanes == planes * expansion"

    m = n * h_ * w_
    # NCHW -> NHWC -> (M, C).  Framework-boundary layout change; for a full
    # NHWC model these transposes disappear.
    x2d = jnp.transpose(x_nchw, (0, 2, 3, 1)).reshape(m, cin)

    # Lane-dense channel padding (multiples of 128); padded weight rows/cols
    # and gamma/beta are zero, so padded channels stay exactly zero end-to-end.
    cin_p = cin + (-cin) % LANES
    p_p = p + (-p) % LANES
    cout_p = cout + (-cout) % LANES

    x2d_p = _pad_to(x2d, (m, cin_p))
    w1_p = _pad_to(w1.T, (cin_p, p_p)).astype(jnp.bfloat16)
    w2_p = _pad_to(w2.T, (p_p, p_p)).astype(jnp.bfloat16)
    w3_p = _pad_to(w3.T, (p_p, cout_p)).astype(jnp.bfloat16)
    g1_p = _pad_to(g1.reshape(1, p), (1, p_p))
    b1_p = _pad_to(b1.reshape(1, p), (1, p_p))
    g2_p = _pad_to(g2.reshape(1, p), (1, p_p))
    b2_p = _pad_to(b2.reshape(1, p), (1, p_p))
    g3_p = _pad_to(g3.reshape(1, cout), (1, cout_p))
    b3_p = _pad_to(b3.reshape(1, cout), (1, cout_p))

    tm_eff = _pick_tile(m, tm)

    # conv1 + bn1 stats
    h1, s1, sq1 = _matmul_with_stats(x2d_p, w1_p, tm_eff)
    sc1, sh1 = _finalize_bn(s1, sq1, m, g1_p, b1_p)
    # bn1 + relu + conv2 + bn2 stats
    h2, s2, sq2 = _bn_relu_matmul_with_stats(h1, sc1, sh1, w2_p, tm_eff)
    sc2, sh2 = _finalize_bn(s2, sq2, m, g2_p, b2_p)
    # bn2 + relu + conv3 + bn3 stats
    h3, s3, sq3 = _bn_relu_matmul_with_stats(h2, sc2, sh2, w3_p, tm_eff)
    sc3, sh3 = _finalize_bn(s3, sq3, m, g3_p, b3_p)
    # bn3 + residual + relu
    out2d = _bn_add_relu(h3, sc3, sh3, x2d_p, tm_eff)

    out2d = out2d[:, :cout]
    return jnp.transpose(out2d.reshape(n, h_, w_, cout), (0, 3, 1, 2))


# ---------------------------------------------------------------------------
# Pure-JAX reference (f32 everywhere, two-pass variance)
# ---------------------------------------------------------------------------

def bottleneck_reference(x_nchw, w1, w2, w3, g1, b1, g2, b2, g3, b3):
    n, cin, h_, w_ = x_nchw.shape
    cout = w3.shape[0]
    x2d = jnp.transpose(x_nchw, (0, 2, 3, 1)).reshape(-1, cin)

    def bn(v, g, b):
        mu = jnp.mean(v, axis=0)
        var = jnp.var(v, axis=0)
        return (v - mu) * jax.lax.rsqrt(var + EPS) * g + b

    h = jnp.maximum(bn(x2d @ w1.T, g1, b1), 0.0)
    h = jnp.maximum(bn(h @ w2.T, g2, b2), 0.0)
    h = bn(h @ w3.T, g3, b3)
    out = jnp.maximum(h + x2d, 0.0)
    return jnp.transpose(out.reshape(n, h_, w_, cout), (0, 3, 1, 2))


if __name__ == "__main__":
    key = jax.random.PRNGKey(0)
    k_x, k_w1, k_w2, k_w3 = jax.random.split(key, 4)

    # Small shapes consistent with the module: Bottleneck_(inplanes=128,
    # planes=32) -> out channels = 32*4 = 128 = inplanes (residual add valid).
    N, H, W = 2, 16, 16
    planes = 32
    inplanes = planes * 4

    x = jax.random.normal(k_x, (N, inplanes, H, W), dtype=jnp.float32)
    w1 = jax.random.normal(k_w1, (planes, inplanes), jnp.float32) / jnp.sqrt(inplanes)
    w2 = jax.random.normal(k_w2, (planes, planes), jnp.float32) / jnp.sqrt(planes)
    w3 = jax.random.normal(k_w3, (planes * 4, planes), jnp.float32) / jnp.sqrt(planes)

    # BatchNorm affine params, PyTorch default init (weight=1, bias=0)
    g1 = jnp.ones((planes,), jnp.float32); b1 = jnp.zeros((planes,), jnp.float32)
    g2 = jnp.ones((planes,), jnp.float32); b2 = jnp.zeros((planes,), jnp.float32)
    g3 = jnp.ones((planes * 4,), jnp.float32); b3 = jnp.zeros((planes * 4,), jnp.float32)

    out = bottleneck_forward(x, w1, w2, w3, g1, b1, g2, b2, g3, b3)
    out = jax.block_until_ready(out)

    ref = bottleneck_reference(x, w1, w2, w3, g1, b1, g2, b2, g3, b3)
    assert out.shape == (N, inplanes, H, W)
    max_err = float(jnp.max(jnp.abs(out - ref)))
    # bf16 matmul operands (f32 accumulation) -> loosened tolerance vs f32 ref
    assert jnp.allclose(out, ref, atol=5e-2, rtol=5e-2), f"mismatch: {max_err}"

    print("KERNEL_OK")
</pallas_src>

<mosaic_0001>
module attributes {stable_mosaic.version = 11 : i64} {
  func.func @_conv_stats_kernel(%arg0: i32, %arg1: memref<256x128xf32, #tpu.memory_space<vmem>>, %arg2: memref<128x128xbf16, #tpu.memory_space<vmem>>, %arg3: memref<256x128xf32, #tpu.memory_space<vmem>>, %arg4: memref<1x128xf32, #tpu.memory_space<vmem>>, %arg5: memref<1x128xf32, #tpu.memory_space<vmem>>) attributes {dimension_semantics = [#tpu.dimension_semantics<arbitrary>], iteration_bounds = array<i64: 2>, scalar_prefetch = 0 : i64, scratch_operands = 0 : i64, tpu.core_type = #tpu.core_type<tc>, window_params = [{transform_indices = @transform_0, window_bounds = array<i64: 256, 128>}, {pipeline_mode = #tpu.pipeline_mode<synchronous>, transform_indices = @transform_1, window_bounds = array<i64: 128, 128>}, {transform_indices = @transform_2, window_bounds = array<i64: 256, 128>}, {pipeline_mode = #tpu.pipeline_mode<synchronous>, transform_indices = @transform_3, window_bounds = array<i64: 1, 128>}, {pipeline_mode = #tpu.pipeline_mode<synchronous>, transform_indices = @transform_4, window_bounds = array<i64: 1, 128>}]} {
    %c0_i32 = arith.constant 0 : i32
    %0 = arith.cmpi eq, %arg0, %c0_i32 : i32
    %1 = arith.extui %0 : i1 to i32
    %c0_i32_0 = arith.constant 0 : i32
    %2 = arith.cmpi ne, %1, %c0_i32_0 : i32
    scf.if %2 {
      %cst_16 = arith.constant 0.000000e+00 : f32
      %19 = vector.broadcast %cst_16 : f32 to vector<1x128xf32>
      %c0_17 = arith.constant 0 : index
      %c0_18 = arith.constant 0 : index
      %20 = vector.load %arg4[%c0_17, %c0_18] : memref<1x128xf32, #tpu.memory_space<vmem>>, vector<1x128xf32>
      tpu.vector_store %arg4[%c0_17, %c0_18], %19 {strides = array<i32>} : memref<1x128xf32, #tpu.memory_space<vmem>>, vector<1x128xf32>,
      %cst_19 = arith.constant 0.000000e+00 : f32
      %21 = vector.broadcast %cst_19 : f32 to vector<1x128xf32>
      %c0_20 = arith.constant 0 : index
      %c0_21 = arith.constant 0 : index
      %22 = vector.load %arg5[%c0_20, %c0_21] : memref<1x128xf32, #tpu.memory_space<vmem>>, vector<1x128xf32>
      tpu.vector_store %arg5[%c0_20, %c0_21], %21 {strides = array<i32>} : memref<1x128xf32, #tpu.memory_space<vmem>>, vector<1x128xf32>,
    } else {
    }
    %c0 = arith.constant 0 : index
    %c0_1 = arith.constant 0 : index
    %3 = vector.load %arg1[%c0, %c0_1] : memref<256x128xf32, #tpu.memory_space<vmem>>, vector<256x128xf32>
    %4 = arith.truncf %3 : vector<256x128xf32> to vector<256x128xbf16>
    %c0_2 = arith.constant 0 : index
    %c0_3 = arith.constant 0 : index
    %5 = vector.load %arg2[%c0_2, %c0_3] : memref<128x128xbf16, #tpu.memory_space<vmem>>, vector<128x128xbf16>
    %cst = arith.constant dense<0.000000e+00> : vector<256x128xf32>
    %6 = tpu.matmul %4, %5, %cst {dimension_numbers = #tpu.dot_dimension_numbers<[1], [0], [0], [1], [0, 0, 1, 1], [], []>} : vector<256x128xbf16>, vector<128x128xbf16>, vector<256x128xf32> -> vector<256x128xf32>
    %c0_4 = arith.constant 0 : index
    %c0_5 = arith.constant 0 : index
    %7 = vector.load %arg3[%c0_4, %c0_5] : memref<256x128xf32, #tpu.memory_space<vmem>>, vector<256x128xf32>
    tpu.vector_store %arg3[%c0_4, %c0_5], %6 {strides = array<i32>} : memref<256x128xf32, #tpu.memory_space<vmem>>, vector<256x128xf32>,
    %c0_6 = arith.constant 0 : index
    %c0_7 = arith.constant 0 : index
    %8 = vector.load %arg4[%c0_6, %c0_7] : memref<1x128xf32, #tpu.memory_space<vmem>>, vector<1x128xf32>
    %cst_8 = arith.constant dense<0.000000e+00> : vector<128xf32>
    %9 = vector.multi_reduction <add>, %6, %cst_8 [0] : vector<256x128xf32> to vector<128xf32>
    %10 = vector.shape_cast %9 : vector<128xf32> to vector<1x128xf32>
    %11 = arith.addf %8, %10 : vector<1x128xf32>
    %c0_9 = arith.constant 0 : index
    %c0_10 = arith.constant 0 : index
    %12 = vector.load %arg4[%c0_9, %c0_10] : memref<1x128xf32, #tpu.memory_space<vmem>>, vector<1x128xf32>
    tpu.vector_store %arg4[%c0_9, %c0_10], %11 {strides = array<i32>} : memref<1x128xf32, #tpu.memory_space<vmem>>, vector<1x128xf32>,
    %c0_11 = arith.constant 0 : index
    %c0_12 = arith.constant 0 : index
    %13 = vector.load %arg5[%c0_11, %c0_12] : memref<1x128xf32, #tpu.memory_space<vmem>>, vector<1x128xf32>
    %14 = arith.mulf %6, %6 : vector<256x128xf32>
    %cst_13 = arith.constant dense<0.000000e+00> : vector<128xf32>
    %15 = vector.multi_reduction <add>, %14, %cst_13 [0] : vector<256x128xf32> to vector<128xf32>
    %16 = vector.shape_cast %15 : vector<128xf32> to vector<1x128xf32>
    %17 = arith.addf %13, %16 : vector<1x128xf32>
    %c0_14 = arith.constant 0 : index
    %c0_15 = arith.constant 0 : index
    %18 = vector.load %arg5[%c0_14, %c0_15] : memref<1x128xf32, #tpu.memory_space<vmem>>, vector<1x128xf32>
    tpu.vector_store %arg5[%c0_14, %c0_15], %17 {strides = array<i32>} : memref<1x128xf32, #tpu.memory_space<vmem>>, vector<1x128xf32>,
    return
  }
  func.func @transform_0(%arg0: i32) -> (i32, i32) {
    %c0_i32 = arith.constant 0 : i32
    %c0_i32_0 = arith.constant 0 : i32
    return %arg0, %c0_i32 : i32, i32
  }
  func.func @transform_1(%arg0: i32) -> (i32, i32) {
    %c0_i32 = arith.constant 0 : i32
    %c0_i32_0 = arith.constant 0 : i32
    %c0_i32_1 = arith.constant 0 : i32
    return %c0_i32, %c0_i32_0 : i32, i32
  }
  func.func @transform_2(%arg0: i32) -> (i32, i32) {
    %c0_i32 = arith.constant 0 : i32
    %c0_i32_0 = arith.constant 0 : i32
    return %arg0, %c0_i32 : i32, i32
  }
  func.func @transform_3(%arg0: i32) -> (i32, i32) {
    %c0_i32 = arith.constant 0 : i32
    %c0_i32_0 = arith.constant 0 : i32
    %c0_i32_1 = arith.constant 0 : i32
    return %c0_i32, %c0_i32_0 : i32, i32
  }
  func.func @transform_4(%arg0: i32) -> (i32, i32) {
    %c0_i32 = arith.constant 0 : i32
    %c0_i32_0 = arith.constant 0 : i32
    %c0_i32_1 = arith.constant 0 : i32
    return %c0_i32, %c0_i32_0 : i32, i32
  }
}

</mosaic_0001>

<bundles_post_ra>
// kernel: tpu_custom_call.1
= control target key start
LH: loop header
LB: loop body
LE: loop exit
PB: predicated region body
PF: predicated region fallthrough
CT: control target
= control target key end

     0   :  { %10 = vsyncpa [#allocation3], 0  ;;  %s1487_s0 = inlined_call_operand.hbm [shape: f32[512,128], index: 0, kind: input, shape index: {}]   ;;  %s1488_s1 = inlined_call_operand.hbm [shape: bf16[128,128], index: 1, kind: input, shape index: {}]   ;;  %s1489_s2 = inlined_call_operand.hbm [shape: f32[512,128], index: 2, kind: output, shape index: {0}]   ;;  %s1490_s3 = inlined_call_operand.hbm [shape: f32[1,128], index: 3, kind: output, shape index: {1}]   ;;  %s1491_s4 = inlined_call_operand.hbm [shape: f32[1,128], index: 4, kind: output, shape index: {2}]  }
   0x1   :  { %12 = vsyncpa [#allocation3 + $0x1], 0 }
   0x2   :  { %13 = vsyncpa [#allocation6], 0 }
   0x3   :  { %14 = vsyncpa [#allocation4], 0 }
   0x4   :  { %16 = vsyncpa [#allocation4 + $0x1], 0 }
   0x5   :  { %17 = vsyncpa [#allocation9], 0  ;;  %s1122_s15 = smov 0   ;;  %s1124_s16 = smov 0  }
   0x6   :  { %s1126_s17 = smov 0   ;;  %s1128_s18 = smov 0  }
   0x7 LB: > { %s1143_s19 = sadd.s32 4294967295, %s1085_s18   ;;  %s730_s20 = sadd.s32 4294967294, %s1085_s18   ;;  %s1085_s18 = sphi %s1128_s18, %s1507_s18   ;;  %s1081_s17 = sphi %s1126_s17, %s1506_s17   ;;  %s1077_s16 = sphi %s1124_s16, %s1505_s16   ;;  %s1073_s15 = sphi %s1122_s15, %s1504_s15  }
   0x8   : > { %p43_p0 = scmp.ne.s32.totalorder %s1077_s16, %s1073_s15  ;;  %p44_p1 = scmp.eq.s32.totalorder %s1143_s19, 0 }
   0x9   : > { %p1492_p2 = scmp.eq.s32.totalorder %s1143_s19, 1  ;;  %p94_p3 = scmp.eq.s32.totalorder %s730_s20, 1 }
   0xa   : > { %p1152_p4 = por %p44_p1, %p43_p0  ;;  %p731_p5 = scmp.ge.s32.totalorder %s1085_s18, 1 }
   0xb   : > { %p1157_p6 = por %p94_p3, %p43_p0  ;;  %p143_p7 = scmp.lt.s32.totalorder %s1085_s18, 3 }
   0xc   : > { %s154_s25 = sshll.u32 %s1488_s1, 4  ;;  %s1087_s27 = smov [#allocation5]   ;;  %s155_s25 = int_to_ptr.hbm [resolvable:$true] %s154_s25 }
   0xd   : > { %p1166_p9 = pnand %p731_p5, %p143_p7  ;;  %s156_s28 = sshll.u32 %s1087_s27, 4  ;;  %s157_s28 = int_to_ptr.vmem [resolvable:$true] %s156_s28 }
   0xe   : > { %s1176_s29 = sadd.s32 1, %s1085_s18   ;;  %s1088_s30 = smov 64  }
   0xf   : > { %p833_p10 = pneg %p1166_p9  ;;  %s1089_s5 = smov 4  }
  0x10   : > { %s27_s6 = ssub.s32 %s1085_s18, %s1176_s29  ;;  %s30_s7 = sadd.s32 1, %s1081_s17 }
  0x11   : > { %p834_p11 = pnand %p833_p10, %p44_p1  ;;  %p28_p13 = scmp.eq.s32.totalorder %s27_s6, 0 }
  0x12   : > { %p37_p0 = scmp.ne.s32.totalorder %s1081_s17, %s1077_s16  ;;  %p38_p3 = scmp.eq.s32.totalorder %s1085_s18, 0 }
  0x13   : > { %836 = dma.hbm_to_vmem [thread:$0]  (!%p834_p11), %s155_s25, 1024, %s157_s28, [#allocation6], %s1088_s30, %s1088_s30, %s1089_s5  }
  0x14   : > { %p846_p5 = scmp.lt.s32.totalorder %s1085_s18, 2  ;;  %p39_p7 = por %p38_p3, %p37_p0 }
  0x15   : > { %s1186_s8 = scalar_select %p28_p13, %s1081_s17, %s30_s7  }
  0x16   : > { %p1190_p10 = por %p1492_p2, %p37_p0  ;;  %s170_s10 = sand.u32 1, %s1081_s17  }
  0x17   : > { %s783_s11 = sshll.u32 %s1085_s18, 8  ;;  %s734_s12 = sshll.u32 %s170_s10, 8 }
  0x18   : > { %s179_s20 = scalar_lea.hbm %s1487_s0, %s783_s11  ;;  %s174_s24 = scalar_lea.vmem [#allocation2], %s734_s12 }
  0x19   : > { %s180_s23 = sshll.u32 %s179_s20, 4  ;;  %s182_s25 = sshll.u32 %s174_s24, 4  ;;  %s181_s23 = int_to_ptr.hbm [resolvable:$true] %s180_s23  ;;  %s183_s25 = int_to_ptr.vmem [resolvable:$true] %s182_s25 }
  0x1a   : > { %p1201_p11 = pnand %p846_p5, %p39_p7  ;;  %s171_s28 = scalar_lea.sflag [#allocation3], %s170_s10 }
  0x1b   : > { %s925_s30 = sshra.s32 %s181_s23, 4  ;;  %s932_s11 = scalar_lea.hbm %s1487_s0, 512  ;;  %s926_s30 = int_to_ptr.hbm [resolvable:$true] %s925_s30 }
  0x1c   : > { %s927_s5 = scalar_lea.hbm %s926_s30, 256  ;;  %p929_p0 = pneg %p1201_p11 }
  0x1d   : > { %p928_p13 = scmp.ne.s32.totalorder %s926_s30, %s927_s5  ;;  %p933_p5 = scmp.lt.s32.totalorder %s926_s30, %s1487_s0 }
  0x1e   : > { %p934_p7 = scmp.lt.s32.totalorder %s932_s11, %s927_s5 }
  0x1f   : > { %p930_p3 = pnand %p929_p0, %p928_p13 }
  0x20   : > { %p935_p2 = por %p934_p7, %p933_p5 }
  0x21   : > { %p931_p12 = pneg %p930_p3 }
  0x23   : > { %p936_p8 = pnand %p935_p2, %p931_p12 }
  0x25   : > { %939 = shalt.err (!%p936_p8)
}
  0x26   : > { %s1090_s10 = smov 128   ;;  %s1091_s14 = smov 8  }
  0x27   : > { %840 = dma.hbm_to_vmem [thread:$0]  (!%p1201_p11), %s181_s23, 4096, %s183_s25, %s171_s28, %s1090_s10, %s1090_s10, %s1091_s14  }
  0x28   : > { %194 = sbr.rel (%p1166_p9) target bundleno = 343 (0x157), region = 28  ;;  %s1218_s20 = sand.u32 (!%p1166_p9), 1, %s1077_s16  }
  0x29   : > { %s738_s24 = sshll.u32 (!%p1166_p9), %s1218_s20, 8  ;;  %s197_s30 = scalar_lea.sflag (!%p1166_p9), [#allocation3], %s1218_s20 }
  0x2a   : > { %s1222_s5 = scalar_lea.vmem (!%p1166_p9), [#allocation2], %s738_s24 }
  0x2d   : > { %1056 = dma.done.wait (%p1152_p4), %s197_s30, 4096  }
  0x2e   : > { %1058 = vsyncadd (%p1152_p4), %s197_s30, 4294963200 }
  0x2f   : > { %1060 = dma.done.wait (%p44_p1), [#allocation6], 1024  }
  0x30   : > { %1062 = vsyncadd (%p44_p1), [#allocation6], 4294966272  ;;  %s1232_s26 = scalar_lea.vmem [#allocation7], %s738_s24  ;;  %p1498_p2 = scmp.ne.s32.totalorder %s1143_s19, 0 }
  0x32   : > { %236 = sbr.rel (%p1498_p2) target bundleno = 58 (0x3a), region = 40 }
  0x37   : > { %v1092_v0 = vmov 0.0  }
  0x38   : > { %237 = vst [vmem:[#allocation8] sm:$0x1] %v1092_v0 }
  0x39   : > { %238 = vst [vmem:[#allocation10] sm:$0x1] %v1092_v0 }
  0x3a PF: > { %v791_v1 = vld [vmem:[#allocation5 + $0x38] sm:$0xff]  ;;  %v790_v2 = vld [vmem:[#allocation5 + $0x30] sm:$0xff]  ;;  %v789_v3 = vld [vmem:[#allocation5 + $0x28] sm:$0xff]  ;;  %s792_s21 = sshll.u32 %s1143_s19, 8  ;;  %s597_s28 = sshll.u32 %s1232_s26, 4  ;;  %s1375_s28 = int_to_ptr.vmem [resolvable:$true] %s597_s28 }
  0x3b   : > { %351 = vmatpush.bf16.msra.mxu0 %v791_v1  ;;  %793 = vmatpush.bf16.msra.mxu1 %v791_v1  ;;  %v788_v4 = vld [vmem:[#allocation5 + $0x20] sm:$0xff]  ;;  %v787_v5 = vld [vmem:[#allocation5 + $0x18] sm:$0xff]  ;;  %v786_v6 = vld [vmem:[#allocation5 + $0x10] sm:$0xff]  ;;  %s596_s27 = scalar_lea.hbm %s1489_s2, %s792_s21  ;;  %s585_s7 = scalar_lea.sflag [#allocation4], %s1218_s20 }
  0x3c   : > { %794 = vmatpush.bf16.msra.mxu2 %v791_v1  ;;  %795 = vmatpush.bf16.msra.mxu3 %v791_v1  ;;  %v785_v7 = vld [vmem:[#allocation5 + $0x8] sm:$0xff]  ;;  %v784_v8 = vld [vmem:[#allocation5] sm:$0xff]  ;;  %v241_v21 = vld [vmem:[%s1222_s5 + $0x10] sm:$0xff]  ;;  %s599_s6 = sshll.u32 %s596_s27, 4  ;;  %s975_s14 = scalar_lea.hbm %s1489_s2, 512  ;;  %s1377_s6 = int_to_ptr.hbm [resolvable:$true] %s599_s6 }
  0x3d   : > { %v239_v9 = vld [vmem:[%s1222_s5] sm:$0xff]  ;;  %v240_v10 = vld [vmem:[%s1222_s5 + $0x8] sm:$0xff]  ;;  %v242_v22 = vld [vmem:[%s1222_s5 + $0x18] sm:$0xff]  ;;  %s969_s11 = sshra.s32 %s1377_s6, 4  ;;  %s970_s11 = int_to_ptr.hbm [resolvable:$true] %s969_s11 }
  0x3e   : > { %v247_v11 = vld [vmem:[%s1222_s5 + $0x40] sm:$0xff]  ;;  %v248_v12 = vld [vmem:[%s1222_s5 + $0x48] sm:$0xff]  ;;  %v271_v15 = vpack.c.bf16 %v240_v10, %v239_v9  ;;  %v249_v23 = vld [vmem:[%s1222_s5 + $0x50] sm:$0xff]  ;;  %v272_v27 = vpack.c.bf16 %v242_v22, %v241_v21  ;;  %s971_s12 = scalar_lea.hbm %s970_s11, 256  ;;  %p976_p9 = scmp.lt.s32.totalorder %s970_s11, %s1489_s2 }
  0x3f   : > { %352 = vmatpush.bf16.msra.mxu0 %v790_v2  ;;  %796 = vmatpush.bf16.msra.mxu1 %v790_v2  ;;  %v255_v13 = vld [vmem:[%s1222_s5 + $0x80] sm:$0xff]  ;;  %v256_v14 = vld [vmem:[%s1222_s5 + $0x88] sm:$0xff]  ;;  %v275_v16 = vpack.c.bf16 %v248_v12, %v247_v11  ;;  %v250_v24 = vld [vmem:[%s1222_s5 + $0x58] sm:$0xff]  ;;  %p972_p1 = scmp.ne.s32.totalorder %s970_s11, %s971_s12  ;;  %p977_p12 = scmp.lt.s32.totalorder %s975_s14, %s971_s12 }
  0x40   : > { %797 = vmatpush.bf16.msra.mxu2 %v790_v2  ;;  %798 = vmatpush.bf16.msra.mxu3 %v790_v2  ;;  %v279_v17 = vpack.c.bf16 %v256_v14, %v255_v13  ;;  %v263_v18 = vld [vmem:[%s1222_s5 + $0xc0] sm:$0xff]  ;;  %v264_v19 = vld [vmem:[%s1222_s5 + $0xc8] sm:$0xff]  ;;  %v257_v25 = vld [vmem:[%s1222_s5 + $0x90] sm:$0xff]  ;;  %v276_v28 = vpack.c.bf16 %v250_v24, %v249_v23 }
  0x41   : > { %v283_v20 = vpack.c.bf16 %v264_v19, %v263_v18  ;;  %v258_v26 = vld [vmem:[%s1222_s5 + $0x98] sm:$0xff]  ;;  %v265_v30 = vld [vmem:[%s1222_s5 + $0xd0] sm:$0xff]  ;;  %v243_v33 = vld [vmem:[%s1222_s5 + $0x20] sm:$0xff]  ;;  %p973_p4 = pnand %p972_p1, %p1190_p10  ;;  %p978_p11 = por %p977_p12, %p976_p9 }
  0x42   : > { %v280_v29 = vpack.c.bf16 %v258_v26, %v257_v25  ;;  %v266_v31 = vld [vmem:[%s1222_s5 + $0xd8] sm:$0xff]  ;;  %v244_v34 = vld [vmem:[%s1222_s5 + $0x28] sm:$0xff]  ;;  %v251_v35 = vld [vmem:[%s1222_s5 + $0x60] sm:$0xff] }
  0x43   : > { %353 = vmatpush.bf16.msra.mxu0 %v789_v3  ;;  %799 = vmatpush.bf16.msra.mxu1 %v789_v3  ;;  %v284_v32 = vpack.c.bf16 %v266_v31, %v265_v30  ;;  %v252_v36 = vld [vmem:[%s1222_s5 + $0x68] sm:$0xff]  ;;  %v259_v37 = vld [vmem:[%s1222_s5 + $0xa0] sm:$0xff]  ;;  %v273_v39 = vpack.c.bf16 %v244_v34, %v243_v33  ;;  %v245_v45 = vld [vmem:[%s1222_s5 + $0x30] sm:$0xff]  ;;  %p974_p8 = pneg %p973_p4 }
  0x44   : > { %800 = vmatpush.bf16.msra.mxu2 %v789_v3  ;;  %801 = vmatpush.bf16.msra.mxu3 %v789_v3  ;;  %v260_v38 = vld [vmem:[%s1222_s5 + $0xa8] sm:$0xff]  ;;  %v277_v40 = vpack.c.bf16 %v252_v36, %v251_v35  ;;  %v267_v41 = vld [vmem:[%s1222_s5 + $0xe0] sm:$0xff]  ;;  %v246_v46 = vld [vmem:[%s1222_s5 + $0x38] sm:$0xff] }
  0x45   : > { %v268_v42 = vld [vmem:[%s1222_s5 + $0xe8] sm:$0xff]  ;;  %v281_v43 = vpack.c.bf16 %v260_v38, %v259_v37  ;;  %v253_v47 = vld [vmem:[%s1222_s5 + $0x70] sm:$0xff]  ;;  %v254_v48 = vld [vmem:[%s1222_s5 + $0x78] sm:$0xff]  ;;  %v274_v51 = vpack.c.bf16 %v246_v46, %v245_v45  ;;  %p979_p13 = pnand %p978_p11, %p974_p8 }
  0x46   : > { %v285_v44 = vpack.c.bf16 %v268_v42, %v267_v41  ;;  %v261_v49 = vld [vmem:[%s1222_s5 + $0xb0] sm:$0xff]  ;;  %v262_v50 = vld [vmem:[%s1222_s5 + $0xb8] sm:$0xff]  ;;  %v278_v52 = vpack.c.bf16 %v254_v48, %v253_v47 }
  0x47   : > { %354 = vmatpush.bf16.msra.mxu0 %v788_v4  ;;  %802 = vmatpush.bf16.msra.mxu1 %v788_v4  ;;  %v269_v53 = vld [vmem:[%s1222_s5 + $0xf0] sm:$0xff]  ;;  %v270_v54 = vld [vmem:[%s1222_s5 + $0xf8] sm:$0xff]  ;;  %v282_v55 = vpack.c.bf16 %v262_v50, %v261_v49 }
  0x48   : > { %803 = vmatpush.bf16.msra.mxu2 %v788_v4  ;;  %804 = vmatpush.bf16.msra.mxu3 %v788_v4  ;;  %v286_v56 = vpack.c.bf16 %v270_v54, %v269_v53 }
  0x4b   : > { %355 = vmatpush.bf16.msra.mxu0 %v787_v5  ;;  %805 = vmatpush.bf16.msra.mxu1 %v787_v5 }
  0x4c   : > { %806 = vmatpush.bf16.msra.mxu2 %v787_v5  ;;  %807 = vmatpush.bf16.msra.mxu3 %v787_v5 }
  0x4f   : > { %356 = vmatpush.bf16.msra.mxu0 %v786_v6  ;;  %808 = vmatpush.bf16.msra.mxu1 %v786_v6 }
  0x50   : > { %809 = vmatpush.bf16.msra.mxu2 %v786_v6  ;;  %810 = vmatpush.bf16.msra.mxu3 %v786_v6 }
  0x53   : > { %357 = vmatpush.bf16.msra.mxu0 %v785_v7  ;;  %811 = vmatpush.bf16.msra.mxu1 %v785_v7 }
  0x54   : > { %812 = vmatpush.bf16.msra.mxu2 %v785_v7  ;;  %813 = vmatpush.bf16.msra.mxu3 %v785_v7 }
  0x57   : > { %358 = vmatpush.bf16.msra.mxu0 %v784_v8  ;;  %814 = vmatpush.bf16.msra.mxu1 %v784_v8 }
  0x58   : > { %815 = vmatpush.bf16.msra.mxu2 %v784_v8  ;;  %816 = vmatpush.bf16.msra.mxu3 %v784_v8 }
  0x5a   : > { %359 = vmatmul.bf16.vlgmr.msra.gmra.mxu0 %v271_v15  ;;  %379 = vmatmul.bf16.vlgmr.msra.gmra.mxu1 %v275_v16 }
  0x5b   : > { %399 = vmatmul.bf16.vlgmr.msra.gmra.mxu2 %v279_v17  ;;  %419 = vmatmul.bf16.vlgmr.msra.gmra.mxu3 %v283_v20 }
  0x6a   : > { %364 = vmatmul.bf16.gmra.mxu0 %v272_v27  ;;  %384 = vmatmul.bf16.gmra.mxu1 %v276_v28 }
  0x6b   : > { %404 = vmatmul.bf16.gmra.mxu2 %v280_v29  ;;  %424 = vmatmul.bf16.gmra.mxu3 %v284_v32 }
  0x7a   : > { %369 = vmatmul.bf16.gmra.mxu0 %v273_v39  ;;  %389 = vmatmul.bf16.gmra.mxu1 %v277_v40 }
  0x7b   : > { %409 = vmatmul.bf16.gmra.mxu2 %v281_v43  ;;  %429 = vmatmul.bf16.gmra.mxu3 %v285_v44 }
  0x8a   : > { %374 = vmatmul.bf16.gmra.mxu0 %v274_v51  ;;  %394 = vmatmul.bf16.gmra.mxu1 %v278_v52 }
  0x8b   : > { %414 = vmatmul.bf16.gmra.mxu2 %v282_v55  ;;  %434 = vmatmul.bf16.gmra.mxu3 %v286_v56 }
  0xd7   : > { %v360_v57 = vpop.f32.mrf.mxu0  ;;  %v1268_v58 = vpop.f32.mrf.mxu1 }
  0xd8   : > { %440 = vst [vmem:[%s1232_s26] sm:$0xff] %v360_v57  ;;  %v513_v16 = vmul.f32 %v360_v57, %v360_v57  ;;  %v521_v44 = vmul.f32 %v1268_v58, %v1268_v58 }
  0xd9   : > { %448 = vst [vmem:[%s1232_s26 + $0x40] sm:$0xff] %v1268_v58 }
  0xde   : > { %v1273_v59 = vpop.f32.mrf.mxu2  ;;  %v1280_v62 = vpop.f32.mrf.mxu3 }
  0xdf   : > { %v362_v60 = vpop.f32.mrf.mxu0  ;;  %v1275_v61 = vpop.f32.mrf.mxu1  ;;  %456 = vst [vmem:[%s1232_s26 + $0x80] sm:$0xff] %v1273_v59 }
  0xe0   : > { %441 = vst [vmem:[%s1232_s26 + $0x8] sm:$0xff] %v362_v60  ;;  %v514_v15 = vmul.f32 %v362_v60, %v362_v60  ;;  %v473_v17 = vadd.f32 %v362_v60, %v360_v57  ;;  %v522_v47 = vmul.f32 %v1275_v61, %v1275_v61 }
  0xe1   : > { %449 = vst [vmem:[%s1232_s26 + $0x48] sm:$0xff] %v1275_v61 }
  0xe2   : > { %464 = vst [vmem:[%s1232_s26 + $0xc0] sm:$0xff] %v1280_v62  ;;  %v545_v19 = vadd.f32 %v514_v15, %v513_v16 }
  0xe6   : > { %v1286_v63 = vpop.f32.mrf.mxu2  ;;  %v1293_v2 = vpop.f32.mrf.mxu3 }
  0xe7   : > { %v365_v0 = vpop.f32.mrf.mxu0  ;;  %v1288_v1 = vpop.f32.mrf.mxu1  ;;  %457 = vst [vmem:[%s1232_s26 + $0x88] sm:$0xff] %v1286_v63 }
  0xe8   : > { %442 = vst [vmem:[%s1232_s26 + $0x10] sm:$0xff] %v365_v0  ;;  %v515_v18 = vmul.f32 %v365_v0, %v365_v0  ;;  %v474_v20 = vadd.f32 %v473_v17, %v365_v0  ;;  %v523_v50 = vmul.f32 %v1288_v1, %v1288_v1 }
  0xe9   : > { %450 = vst [vmem:[%s1232_s26 + $0x50] sm:$0xff] %v1288_v1 }
  0xea   : > { %465 = vst [vmem:[%s1232_s26 + $0xc8] sm:$0xff] %v1293_v2  ;;  %v546_v25 = vadd.f32 %v545_v19, %v515_v18 }
  0xee   : > { %v1299_v3 = vpop.f32.mrf.mxu2  ;;  %v1306_v6 = vpop.f32.mrf.mxu3 }
  0xef   : > { %v367_v4 = vpop.f32.mrf.mxu0  ;;  %v1301_v5 = vpop.f32.mrf.mxu1  ;;  %458 = vst [vmem:[%s1232_s26 + $0x90] sm:$0xff] %v1299_v3 }
  0xf0   : > { %443 = vst [vmem:[%s1232_s26 + $0x18] sm:$0xff] %v367_v4  ;;  %v516_v21 = vmul.f32 %v367_v4, %v367_v4  ;;  %v475_v26 = vadd.f32 %v474_v20, %v367_v4  ;;  %v524_v54 = vmul.f32 %v1301_v5, %v1301_v5 }
  0xf1   : > { %451 = vst [vmem:[%s1232_s26 + $0x58] sm:$0xff] %v1301_v5 }
  0xf2   : > { %466 = vst [vmem:[%s1232_s26 + $0xd0] sm:$0xff] %v1306_v6  ;;  %v547_v29 = vadd.f32 %v546_v25, %v516_v21 }
  0xf6   : > { %v1312_v7 = vpop.f32.mrf.mxu2  ;;  %v1319_v10 = vpop.f32.mrf.mxu3 }
  0xf7   : > { %v370_v8 = vpop.f32.mrf.mxu0  ;;  %v1314_v9 = vpop.f32.mrf.mxu1  ;;  %459 = vst [vmem:[%s1232_s26 + $0x98] sm:$0xff] %v1312_v7 }
  0xf8   : > { %444 = vst [vmem:[%s1232_s26 + $0x20] sm:$0xff] %v370_v8  ;;  %v517_v27 = vmul.f32 %v370_v8, %v370_v8  ;;  %v476_v30 = vadd.f32 %v475_v26, %v370_v8 }
  0xf9   : > { %452 = vst [vmem:[%s1232_s26 + $0x60] sm:$0xff] %v1314_v9 }
  0xfa   : > { %467 = vst [vmem:[%s1232_s26 + $0xd8] sm:$0xff] %v1319_v10  ;;  %v548_v32 = vadd.f32 %v547_v29, %v517_v27 }
  0xfe   : > { %v1325_v11 = vpop.f32.mrf.mxu2  ;;  %v1332_v14 = vpop.f32.mrf.mxu3 }
  0xff   : > { %v372_v12 = vpop.f32.mrf.mxu0  ;;  %v1327_v13 = vpop.f32.mrf.mxu1  ;;  %460 = vst [vmem:[%s1232_s26 + $0xa0] sm:$0xff] %v1325_v11 }
 0x100   : > { %445 = vst [vmem:[%s1232_s26 + $0x28] sm:$0xff] %v372_v12  ;;  %v518_v31 = vmul.f32 %v372_v12, %v372_v12  ;;  %v477_v33 = vadd.f32 %v476_v30, %v372_v12 }
 0x101   : > { %453 = vst [vmem:[%s1232_s26 + $0x68] sm:$0xff] %v1327_v13 }
 0x102   : > { %468 = vst [vmem:[%s1232_s26 + $0xe0] sm:$0xff] %v1332_v14  ;;  %v549_v35 = vadd.f32 %v548_v32, %v518_v31 }
 0x106   : > { %v1338_v22 = vpop.f32.mrf.mxu2  ;;  %v1345_v28 = vpop.f32.mrf.mxu3 }
 0x107   : > { %v375_v23 = vpop.f32.mrf.mxu0  ;;  %v1340_v24 = vpop.f32.mrf.mxu1  ;;  %461 = vst [vmem:[%s1232_s26 + $0xa8] sm:$0xff] %v1338_v22 }
 0x108   : > { %446 = vst [vmem:[%s1232_s26 + $0x30] sm:$0xff] %v375_v23  ;;  %v519_v34 = vmul.f32 %v375_v23, %v375_v23  ;;  %v478_v36 = vadd.f32 %v477_v33, %v375_v23 }
 0x109   : > { %454 = vst [vmem:[%s1232_s26 + $0x70] sm:$0xff] %v1340_v24 }
 0x10a   : > { %469 = vst [vmem:[%s1232_s26 + $0xe8] sm:$0xff] %v1345_v28  ;;  %v550_v40 = vadd.f32 %v549_v35, %v519_v34 }
 0x10e   : > { %v1352_v37 = vpop.f32.mrf.mxu2  ;;  %v1357_v43 = vpop.f32.mrf.mxu3 }
 0x10f   : > { %v377_v38 = vpop.f32.mrf.mxu0  ;;  %v397_v39 = vpop.f32.mrf.mxu1  ;;  %462 = vst [vmem:[%s1232_s26 + $0xb0] sm:$0xff] %v1352_v37 }
 0x110   : > { %447 = vst [vmem:[%s1232_s26 + $0x38] sm:$0xff] %v377_v38  ;;  %v479_v41 = vadd.f32 %v478_v36, %v377_v38  ;;  %v520_v42 = vmul.f32 %v377_v38, %v377_v38 }
 0x111   : > { %455 = vst [vmem:[%s1232_s26 + $0x78] sm:$0xff] %v397_v39 }
 0x112   : > { %v480_v45 = vadd.f32 %v479_v41, %v1268_v58  ;;  %v551_v46 = vadd.f32 %v550_v40, %v520_v42  ;;  %470 = vst [vmem:[%s1232_s26 + $0xf0] sm:$0xff] %v1357_v43  ;;  %v525_v58 = vmul.f32 %v1314_v9, %v1314_v9 }
 0x114   : > { %v481_v48 = vadd.f32 %v480_v45, %v1275_v61  ;;  %v552_v49 = vadd.f32 %v551_v46, %v521_v44 }
 0x116   : > { %v482_v51 = vadd.f32 %v481_v48, %v1288_v1  ;;  %v553_v52 = vadd.f32 %v552_v49, %v522_v47  ;;  %v417_v53 = vpop.f32.mrf.mxu2  ;;  %v1383_v57 = vpop.f32.mrf.mxu3 }
 0x117   : > { %463 = vst [vmem:[%s1232_s26 + $0xb8] sm:$0xff] %v417_v53 }
 0x118   : > { %v554_v55 = vadd.f32 %v553_v52, %v523_v50  ;;  %v483_v56 = vadd.f32 %v482_v51, %v1301_v5  ;;  %471 = vst [vmem:[%s1232_s26 + $0xf8] sm:$0xff] %v1383_v57 }
 0x11a   : > { %v484_v60 = vadd.f32 %v483_v56, %v1314_v9  ;;  %v555_v61 = vadd.f32 %v554_v55, %v524_v54 }
 0x11b   : > { %982 = shalt.err (!%p979_p13)
}
 0x11c   : > { %s1093_s20 = smov 128   ;;  %s1094_s5 = smov 8   ;;  %v526_v0 = vmul.f32 %v1327_v13, %v1327_v13  ;;  %v485_v1 = vadd.f32 %v484_v60, %v1327_v13  ;;  %v556_v4 = vadd.f32 %v555_v61, %v525_v58  ;;  %v527_v8 = vmul.f32 %v1340_v24, %v1340_v24 }
 0x11d   : > { %823 = dma.vmem_to_hbm [thread:$0]  (%p1190_p10), %s1375_s28, 4096, %s1377_s6, %s585_s7, %s1093_s20, %s1093_s20, %s1094_s5   ;;  %v528_v16 = vmul.f32 %v397_v39, %v397_v39  ;;  %v529_v17 = vmul.f32 %v1273_v59, %v1273_v59  ;;  %v530_v20 = vmul.f32 %v1286_v63, %v1286_v63  ;;  %v531_v23 = vmul.f32 %v1299_v3, %v1299_v3 }
 0x11e   : > { %v486_v5 = vadd.f32 %v485_v1, %v1340_v24  ;;  %v557_v9 = vadd.f32 %v556_v4, %v526_v0  ;;  %v532_v26 = vmul.f32 %v1312_v7, %v1312_v7  ;;  %v534_v32 = vmul.f32 %v1338_v22, %v1338_v22  ;;  %s1095_s9 = smov [#allocation8]   ;;  %s614_s25 = sshll.u32 %s1490_s3, 4  ;;  %s615_s25 = int_to_ptr.hbm [resolvable:$true] %s614_s25 }
 0x11f   : > { %v535_v35 = vmul.f32 %v1352_v37, %v1352_v37  ;;  %v536_v38 = vmul.f32 %v417_v53, %v417_v53  ;;  %v538_v41 = vmul.f32 %v1293_v2, %v1293_v2  ;;  %v539_v44 = vmul.f32 %v1306_v6, %v1306_v6  ;;  %s612_s26 = sshll.u32 %s1095_s9, 4  ;;  %s1096_s27 = smov [#allocation10]   ;;  %s613_s26 = int_to_ptr.vmem [resolvable:$true] %s612_s26 }
 0x120   : > { %v558_v12 = vadd.f32 %v557_v9, %v527_v8  ;;  %v487_v15 = vadd.f32 %v486_v5, %v397_v39  ;;  %v537_v39 = vmul.f32 %v1280_v62, %v1280_v62  ;;  %v540_v46 = vmul.f32 %v1319_v10, %v1319_v10  ;;  %v472_v9 = vld [vmem:[#allocation8] sm:$0x1]  ;;  %s624_s28 = sshll.u32 %s1096_s27, 4  ;;  %s626_s11 = sshll.u32 %s1491_s4, 4  ;;  %s625_s28 = int_to_ptr.vmem [resolvable:$true] %s624_s28  ;;  %s627_s11 = int_to_ptr.hbm [resolvable:$true] %s626_s11 }
 0x121   : > { %v542_v51 = vmul.f32 %v1345_v28, %v1345_v28  ;;  %v543_v54 = vmul.f32 %v1357_v43, %v1357_v43  ;;  %v544_v56 = vmul.f32 %v1383_v57, %v1383_v57  ;;  %p1499_p10 = scmp.eq.s32.totalorder %s1143_s19, 1 }
 0x122   : > { %v488_v18 = vadd.f32 %v487_v15, %v1273_v59  ;;  %v559_v19 = vadd.f32 %v558_v12, %v528_v16  ;;  %v533_v59 = vmul.f32 %v1325_v11, %v1325_v11  ;;  %v512_v12 = vld [vmem:[#allocation10] sm:$0x1] }
 0x123   : > { %p1500_p0 = pmov %p1499_p10 }
 0x124   : > { %v489_v13 = vadd.f32 %v488_v18, %v1286_v63  ;;  %v560_v21 = vadd.f32 %v559_v19, %v529_v17 }
 0x125   : > { %p1501_p3 = pmov %p1500_p0 }
 0x126   : > { %v490_v24 = vadd.f32 %v489_v13, %v1299_v3  ;;  %v561_v25 = vadd.f32 %v560_v21, %v530_v20 }
 0x128   : > { %v562_v27 = vadd.f32 %v561_v25, %v531_v23  ;;  %v491_v29 = vadd.f32 %v490_v24, %v1312_v7 }
 0x12a   : > { %v492_v30 = vadd.f32 %v491_v29, %v1325_v11  ;;  %v563_v31 = vadd.f32 %v562_v27, %v532_v26 }
 0x12c   : > { %v493_v63 = vadd.f32 %v492_v30, %v1338_v22  ;;  %v564_v33 = vadd.f32 %v563_v31, %v533_v59 }
 0x12e   : > { %v565_v3 = vadd.f32 %v564_v33, %v534_v32  ;;  %v494_v34 = vadd.f32 %v493_v63, %v1352_v37 }
 0x130   : > { %v566_v36 = vadd.f32 %v565_v3, %v535_v35  ;;  %v495_v7 = vadd.f32 %v494_v34, %v417_v53 }
 0x132   : > { %v496_v11 = vadd.f32 %v495_v7, %v1280_v62  ;;  %v567_v40 = vadd.f32 %v566_v36, %v536_v38  ;;  %v541_v62 = vmul.f32 %v1332_v14, %v1332_v14 }
 0x134   : > { %v497_v22 = vadd.f32 %v496_v11, %v1293_v2  ;;  %v568_v42 = vadd.f32 %v567_v40, %v537_v39 }
 0x136   : > { %v498_v37 = vadd.f32 %v497_v22, %v1306_v6  ;;  %v569_v45 = vadd.f32 %v568_v42, %v538_v41 }
 0x138   : > { %v570_v47 = vadd.f32 %v569_v45, %v539_v44  ;;  %v499_v48 = vadd.f32 %v498_v37, %v1319_v10 }
 0x13a   : > { %v500_v49 = vadd.f32 %v499_v48, %v1332_v14  ;;  %v571_v50 = vadd.f32 %v570_v47, %v540_v46 }
 0x13c   : > { %v501_v2 = vadd.f32 %v500_v49, %v1345_v28  ;;  %v572_v52 = vadd.f32 %v571_v50, %v541_v62 }
 0x13e   : > { %v573_v6 = vadd.f32 %v572_v52, %v542_v51  ;;  %v502_v53 = vadd.f32 %v501_v2, %v1357_v43 }
 0x140   : > { %v574_v55 = vadd.f32 %v573_v6, %v543_v54  ;;  %v503_v10 = vadd.f32 %v502_v53, %v1383_v57 }
 0x142   : > { %v504_v14 = vrot.slane %v503_v10, 4  ;;  %v575_v58 = vadd.f32 %v574_v55, %v544_v56 }
 0x144   : > { %v505_v60 = vadd.f32 %v504_v14, %v503_v10  ;;  %v576_v61 = vrot.slane %v575_v58, 4 }
 0x146   : > { %v506_v0 = vrot.slane %v505_v60, 2  ;;  %v577_v1 = vadd.f32 %v576_v61, %v575_v58 }
 0x148   : > { %v507_v28 = vadd.f32 %v506_v0, %v505_v60  ;;  %v578_v4 = vrot.slane %v577_v1, 2 }
 0x14a   : > { %v579_v5 = vadd.f32 %v578_v4, %v577_v1  ;;  %v508_v8 = vrot.slane %v507_v28, 1 }
 0x14c   : > { %v509_v43 = vadd.f32 %v508_v8, %v507_v28  ;;  %v580_v57 = vrot.slane %v579_v5, 1 }
 0x14e   : > { %v510_v15 = vadd.f32 %v509_v43, %v472_v9  ;;  %v581_v16 = vadd.f32 %v580_v57, %v579_v5 }
 0x150   : > { %511 = vst [vmem:[#allocation8] sm:$0x1] %v510_v15  ;;  %v582_v17 = vadd.f32 %v581_v16, %v512_v12 }
 0x151   : > { %825 = dma.vmem_to_hbm [thread:$0]  (%p1499_p10), %s613_s26, 16, %s615_s25, [#allocation9]  }
 0x152   : > { %583 = vst [vmem:[#allocation10] sm:$0x1] %v582_v17 }
 0x153   : > { %827 = dma.vmem_to_hbm [thread:$0]  (%p1500_p0), %s625_s28, 16, %s627_s11, [#allocation9]  }
 0x154   : > { %1064 = dma.done.wait (%p1501_p3), [#allocation9], 32   ;;  %p1502_p5 = pmov %p1500_p0 }
 0x156   : > { %1066 = vsyncadd (%p1502_p5), [#allocation9], 4294967264 }
 0x157 PF: > { %s648_s12 = sand.u32 1, %s1073_s15   ;;  %p1503_p7 = scmp.ge.s32.totalorder %s1085_s18, 2 }
 0x158   : > { %s649_s13 = scalar_lea.sflag [#allocation4], %s648_s12 }
 0x159   : > { %p842_p2 = pnand %p1503_p7, %p1157_p6 }
 0x15b   : > { %p843_p1 = pneg %p842_p2 }
 0x15d   : > { %1068 = dma.done.wait (%p843_p1), %s649_s13, 4096  }
 0x15e   : > { %1070 = vsyncadd (%p843_p1), %s649_s13, 4294963200  ;;  %p20_p4 = scmp.ge.s32.totalorder %s1176_s29, 4   ;;  %s1504_s15 = smov %s1077_s16 }
 0x15f   : > { %s1505_s16 = smov %s1081_s17  ;;  %s1506_s17 = smov %s1186_s8 }
 0x160   : > { %s1507_s18 = smov %s1176_s29  ;;  %22 = sbr.rel (!%p20_p4) target bundleno = 7 (0x7), region = 97 }
 0x165   :  { %655 = vsyncpa [#allocation3], 1 }
 0x166   :  { %657 = vsyncpa [#allocation3 + $0x1], 1 }
 0x167   :  { %658 = vsyncpa [#allocation6], 1 }
 0x168   :  { %659 = vsyncpa [#allocation4], 1 }
 0x169   :  { %661 = vsyncpa [#allocation4 + $0x1], 1 }
 0x16a   :  { %662 = vsyncpa [#allocation9], 1 }

</bundles_post_ra>
